<compile_context>
chip_gen: v5e
topology: v5e:2x2
jax: 0.10.0
libtpu: 0.0.40
codegen_flags: <defaults>
</compile_context>

<pallas_src>
import functools

import jax
import jax.numpy as jnp
from jax import lax
from jax.experimental import pallas as pl
from jax.experimental.pallas import tpu as pltpu


_VMEM_BUDGET = 26 * 1024 * 1024      # target double-buffered footprint (fits v7x)
_VMEM_LIMIT = 48 * 1024 * 1024       # scoped VMEM limit (< 64 MiB v7x physical)
_TM_CAP, _TN_CAP, _TK_CAP = 512, 512, 2048


def _round_up(x, m):
    return ((x + m - 1) // m) * m


def _cdiv(a, b):
    return (a + b - 1) // b


def _sublane_min(dtype):
    return {4: 8, 2: 16, 1: 32}.get(jnp.dtype(dtype).itemsize, 8)


def _apply_activation(y, activation):
    if activation in (None, "linear"):
        return y
    if activation == "relu":
        return jnp.maximum(y, 0.0)
    if activation == "sigmoid":
        return jax.nn.sigmoid(y)
    if activation == "tanh":
        return jnp.tanh(y)
    if activation == "selu":
        return jax.nn.selu(y)
    if activation == "swish":
        return jax.nn.silu(y)
    if activation == "leaky_relu":
        return jax.nn.leaky_relu(y)
    if activation == "elu":
        return jax.nn.elu(y)
    raise ValueError(f"unknown activation: {activation}")


def _dot_nt(x, w):
    # (m, k) x (n, k) -> (m, n): contract on in_dim of both operands (weight
    # stays in its stored (out_dim, in_dim) layout), f32 accumulation on MXU.
    return lax.dot_general(x, w, dimension_numbers=(((1,), (1,)), ((), ())),
                           preferred_element_type=jnp.float32)


# ----------------------------- kernels --------------------------------------

def _resident_w_kernel(x_ref, w_ref, scale_ref, bias_ref, out_ref, *, activation):
    # Whole W / scale / bias resident in VMEM; single matmul per batch tile.
    y = _dot_nt(x_ref[...], w_ref[...])
    y = y * scale_ref[...] + bias_ref[...]
    out_ref[...] = _apply_activation(y, activation).astype(out_ref.dtype)


def _tiled_inplace_kernel(x_ref, w_ref, scale_ref, bias_ref, out_ref, *, activation):
    # f32 output: accumulate directly in the resident output block (no scratch).
    k = pl.program_id(2)

    @pl.when(k == 0)
    def _():
        out_ref[...] = jnp.zeros_like(out_ref)

    out_ref[...] += _dot_nt(x_ref[...], w_ref[...])

    @pl.when(k == pl.num_programs(2) - 1)
    def _():
        y = out_ref[...] * scale_ref[...] + bias_ref[...]
        out_ref[...] = _apply_activation(y, activation)


def _tiled_scratch_kernel(x_ref, w_ref, scale_ref, bias_ref, out_ref, acc_ref,
                          *, activation):
    # Narrow output dtype: accumulate in f32 scratch, cast on the last K step.
    k = pl.program_id(2)

    @pl.when(k == 0)
    def _():
        acc_ref[...] = jnp.zeros_like(acc_ref)

    acc_ref[...] += _dot_nt(x_ref[...], w_ref[...])

    @pl.when(k == pl.num_programs(2) - 1)
    def _():
        y = acc_ref[...] * scale_ref[...] + bias_ref[...]
        out_ref[...] = _apply_activation(y, activation).astype(out_ref.dtype)


# ----------------------------- wrapper ---------------------------------------

def batch_normed_weights_linear(x, weight, weight_scale, bias, running_mean, *,
                                alpha=0.01, weight_correction_scale=None,
                                training=True, activation="relu",
                                compute_dtype=None,
                                max_resident_weight_bytes=8 * 1024 * 1024):
    """Returns (out, new_running_mean). Shapes follow the PyTorch module."""
    batch, in_dim = x.shape
    out_dim, in_dim_w = weight.shape
    assert in_dim == in_dim_w
    if weight_correction_scale is None:
        weight_correction_scale = (2.0 ** 0.5) / (in_dim ** 0.5)
    wcs = jnp.float32(weight_correction_scale)

    # ---- buffer update (hoisted; cheap HBM-bound reduction) -----------------
    rm = running_mean.reshape(()).astype(jnp.float32)
    if training:
        new_mean = (1.0 - alpha) * rm + alpha * jnp.mean(x.astype(jnp.float32))
    else:
        new_mean = rm
    # NOTE: matches the PyTorch reference; no epsilon guard near new_mean == 0.

    # ---- fold per-row + global scale into lane-dense (1, out_dim) rows ------
    row_scale = (weight_scale.astype(jnp.float32) * (wcs / new_mean)).reshape(1, out_dim)
    bias_row = bias if bias is not None else jnp.zeros((out_dim,), jnp.float32)
    bias_row = bias_row.astype(jnp.float32).reshape(1, out_dim)

    out_dtype = x.dtype
    # Optional bf16 MXU path (v6e / v7x). In a real model the weight cast
    # would be hoisted out of the per-call path (stored once as a parameter).
    x_c = x if compute_dtype is None else x.astype(compute_dtype)
    w_c = weight if compute_dtype is None else weight.astype(compute_dtype)

    x_b = jnp.dtype(x_c.dtype).itemsize
    w_b = jnp.dtype(w_c.dtype).itemsize
    o_b = jnp.dtype(out_dtype).itemsize
    sub = _sublane_min(x_c.dtype)

    transcendental = activation in ("sigmoid", "tanh", "selu", "swish", "elu")
    cost = pl.CostEstimate(
        flops=2 * batch * out_dim * in_dim,
        transcendentals=batch * out_dim if transcendental else 0,
        bytes_accessed=(batch * in_dim * x_b + out_dim * in_dim * w_b
                        + batch * out_dim * o_b + 2 * out_dim * 4))

    w_total_bytes = out_dim * in_dim * w_b
    per_row_bytes = 2 * (in_dim * x_b + out_dim * o_b)          # double-buffered x/out
    fast_avail = _VMEM_BUDGET - 2 * w_total_bytes - 4 * out_dim * 4
    use_fast = (w_total_bytes <= max_resident_weight_bytes
                and fast_avail >= per_row_bytes * sub)

    if use_fast:
        # -------- fast path: resident W, 1-D parallel grid over batch -------
        tm_budget = max(sub, (fast_avail // per_row_bytes) // sub * sub)
        tm = min(1024, batch, tm_budget)
        # keep >= 2 parallel batch tiles so v7x's two TensorCores both work
        if _cdiv(batch, tm) < 2 and batch >= 2 * sub:
            tm = _round_up(_cdiv(batch, 2), sub)
        grid = (_cdiv(batch, tm),)

        out = pl.pallas_call(
            functools.partial(_resident_w_kernel, activation=activation),
            out_shape=jax.ShapeDtypeStruct((batch, out_dim), out_dtype),
            grid_spec=pltpu.PrefetchScalarGridSpec(
                num_scalar_prefetch=0,
                grid=grid,
                in_specs=[
                    pl.BlockSpec((tm, in_dim), lambda i: (i, 0)),       # x tile
                    pl.BlockSpec((out_dim, in_dim), lambda i: (0, 0)),  # W (resident)
                    pl.BlockSpec((1, out_dim), lambda i: (0, 0)),       # row scale
                    pl.BlockSpec((1, out_dim), lambda i: (0, 0)),       # bias
                ],
                out_specs=pl.BlockSpec((tm, out_dim), lambda i: (i, 0)),
            ),
            compiler_params=pltpu.CompilerParams(
                dimension_semantics=("parallel",),
                vmem_limit_bytes=_VMEM_LIMIT),
            cost_estimate=cost,
        )(x_c, w_c, row_scale, bias_row)
        return out, new_mean.reshape(1)

    # -------- general path: large-tile (M, N, K) matmul ----------------------
    tm = min(_TM_CAP, batch)
    tn = min(_TN_CAP, out_dim)
    if in_dim <= _TK_CAP:
        tk, k_pad = in_dim, in_dim                       # full-K block, no padding
    else:
        k_pad = _round_up(in_dim, 128)
        q = k_pad // 128
        d = max(dd for dd in range(1, q + 1) if q % dd == 0 and dd * 128 <= _TK_CAP)
        tk = d * 128

    acc_in_out = jnp.dtype(out_dtype) == jnp.dtype(jnp.float32)

    def _footprint(tm_):
        fp = 2 * (tm_ * tk * x_b + tn * tk * w_b + tm_ * tn * o_b) + 4 * tn * 4
        if not acc_in_out:
            fp += tm_ * tn * 4
        return fp

    while tm > sub and _footprint(tm) > _VMEM_BUDGET:
        tm = max(sub, (tm // 2) // sub * sub)

    # keep >= 2 parallel output tiles for v7x's two TensorCores when possible
    if _cdiv(batch, tm) * _cdiv(out_dim, tn) < 2 and batch >= 2 * sub:
        tm = _round_up(_cdiv(batch, 2), sub)

    # K padding (zeros) is required for correctness when K is tiled raggedly.
    # Ragged M / N are handled by cdiv grids + partial boundary blocks.
    if k_pad != in_dim:
        x_c = jnp.pad(x_c, ((0, 0), (0, k_pad - in_dim)))
        w_c = jnp.pad(w_c, ((0, 0), (0, k_pad - in_dim)))

    grid = (_cdiv(batch, tm), _cdiv(out_dim, tn), k_pad // tk)

    if acc_in_out:
        kernel = functools.partial(_tiled_inplace_kernel, activation=activation)
        scratch_shapes = []
    else:
        kernel = functools.partial(_tiled_scratch_kernel, activation=activation)
        scratch_shapes = [pltpu.VMEM((tm, tn), jnp.float32)]

    out = pl.pallas_call(
        kernel,
        out_shape=jax.ShapeDtypeStruct((batch, out_dim), out_dtype),
        grid_spec=pltpu.PrefetchScalarGridSpec(
            num_scalar_prefetch=0,
            grid=grid,
            in_specs=[
                pl.BlockSpec((tm, tk), lambda i, j, k: (i, k)),   # x
                pl.BlockSpec((tn, tk), lambda i, j, k: (j, k)),   # W (reused over i)
                pl.BlockSpec((1, tn), lambda i, j, k: (0, j)),    # row scale
                pl.BlockSpec((1, tn), lambda i, j, k: (0, j)),    # bias
            ],
            out_specs=pl.BlockSpec((tm, tn), lambda i, j, k: (i, j)),
            scratch_shapes=scratch_shapes,
        ),
        compiler_params=pltpu.CompilerParams(
            dimension_semantics=("parallel", "parallel", "arbitrary"),
            vmem_limit_bytes=_VMEM_LIMIT),
        cost_estimate=cost,
    )(x_c, w_c, row_scale, bias_row)
    return out, new_mean.reshape(1)


if __name__ == "__main__":
    key = jax.random.PRNGKey(0)
    batch, in_dim, out_dim = 8, 32, 16
    alpha = 0.01
    wcs = (2.0 ** 0.5) / (in_dim ** 0.5)

    kx, kw = jax.random.split(key)
    x = jax.random.normal(kx, (batch, in_dim), jnp.float32)
    weight = jax.random.normal(kw, (out_dim, in_dim), jnp.float32)   # torch.randn init
    bias = jnp.zeros((out_dim,), jnp.float32)                        # bias_init = 0
    weight_scale = jnp.ones((out_dim,), jnp.float32)
    running_mean = jnp.ones((1,), jnp.float32)                       # buffer init

    def reference(x_, w_, training):
        xf = x_.astype(jnp.float32)
        wf = w_.astype(jnp.float32)
        if training:
            rm = (1 - alpha) * running_mean + alpha * jnp.mean(jnp.mean(xf, axis=0))
        else:
            rm = running_mean
        sw = wf * weight_scale[:, None] * (wcs / rm)
        out = xf @ sw.T + bias
        return jnp.maximum(out, 0.0), rm

    # 1) fast path (resident W), f32, training mode
    out, new_rm = batch_normed_weights_linear(
        x, weight, weight_scale, bias, running_mean,
        alpha=alpha, weight_correction_scale=wcs, training=True, activation="relu")
    jax.block_until_ready((out, new_rm))
    ref_out, ref_rm = reference(x, weight, True)
    assert jnp.allclose(out, ref_out, atol=1e-4, rtol=1e-4), \
        float(jnp.max(jnp.abs(out - ref_out)))
    assert jnp.allclose(new_rm, ref_rm, atol=1e-6, rtol=1e-6)

    # 2) eval mode (buffer not updated)
    out_e, rm_e = batch_normed_weights_linear(
        x, weight, weight_scale, bias, running_mean,
        alpha=alpha, weight_correction_scale=wcs, training=False, activation="relu")
    jax.block_until_ready((out_e, rm_e))
    ref_out_e, ref_rm_e = reference(x, weight, False)
    assert jnp.allclose(out_e, ref_out_e, atol=1e-4, rtol=1e-4)
    assert jnp.allclose(rm_e, ref_rm_e, atol=1e-6, rtol=1e-6)

    # 3) general tiled path (forced), f32 output -> in-place accumulation kernel
    out_t, rm_t = batch_normed_weights_linear(
        x, weight, weight_scale, bias, running_mean,
        alpha=alpha, weight_correction_scale=wcs, training=True, activation="relu",
        max_resident_weight_bytes=0)
    jax.block_until_ready((out_t, rm_t))
    assert jnp.allclose(out_t, ref_out, atol=1e-4, rtol=1e-4)
    assert jnp.allclose(rm_t, ref_rm, atol=1e-6, rtol=1e-6)

    # 4) bf16 operands (v6e/v7x MXU bf16 path), forced tiled -> f32 scratch kernel
    x_bf = x.astype(jnp.bfloat16)
    w_bf = weight.astype(jnp.bfloat16)
    out_b, rm_b = batch_normed_weights_linear(
        x_bf, w_bf, weight_scale, bias, running_mean,
        alpha=alpha, weight_correction_scale=wcs, training=True, activation="relu",
        max_resident_weight_bytes=0)
    jax.block_until_ready((out_b, rm_b))
    ref_out_b, ref_rm_b = reference(x_bf, w_bf, True)
    assert jnp.allclose(out_b.astype(jnp.float32), ref_out_b, atol=5e-2, rtol=5e-2)
    assert jnp.allclose(rm_b, ref_rm_b, atol=1e-3, rtol=1e-3)

    print("KERNEL_OK")
</pallas_src>

<mosaic_0001>
module attributes {stable_mosaic.version = 11 : i64} {
  func.func @_resident_w_kernel(%arg0: i32, %arg1: memref<8x32xf32, #tpu.memory_space<vmem>>, %arg2: memref<16x32xf32, #tpu.memory_space<vmem>>, %arg3: memref<1x16xf32, #tpu.memory_space<vmem>>, %arg4: memref<1x16xf32, #tpu.memory_space<vmem>>, %arg5: memref<8x16xf32, #tpu.memory_space<vmem>>) attributes {dimension_semantics = [#tpu.dimension_semantics<parallel>], iteration_bounds = array<i64: 1>, scalar_prefetch = 0 : i64, scratch_operands = 0 : i64, tpu.core_type = #tpu.core_type<tc>, window_params = [{transform_indices = @transform_0, window_bounds = array<i64: 8, 32>}, {pipeline_mode = #tpu.pipeline_mode<synchronous>, transform_indices = @transform_1, window_bounds = array<i64: 16, 32>}, {pipeline_mode = #tpu.pipeline_mode<synchronous>, transform_indices = @transform_2, window_bounds = array<i64: 1, 16>}, {pipeline_mode = #tpu.pipeline_mode<synchronous>, transform_indices = @transform_3, window_bounds = array<i64: 1, 16>}, {transform_indices = @transform_4, window_bounds = array<i64: 8, 16>}]} {
    %c0 = arith.constant 0 : index
    %c0_0 = arith.constant 0 : index
    %0 = vector.load %arg1[%c0, %c0_0] : memref<8x32xf32, #tpu.memory_space<vmem>>, vector<8x32xf32>
    %c0_1 = arith.constant 0 : index
    %c0_2 = arith.constant 0 : index
    %1 = vector.load %arg2[%c0_1, %c0_2] : memref<16x32xf32, #tpu.memory_space<vmem>>, vector<16x32xf32>
    %cst = arith.constant dense<0.000000e+00> : vector<8x16xf32>
    %2 = tpu.matmul %0, %1, %cst {dimension_numbers = #tpu.dot_dimension_numbers<[1], [1], [0], [0], [0, 0, 1, 0], [], []>} : vector<8x32xf32>, vector<16x32xf32>, vector<8x16xf32> -> vector<8x16xf32>
    %c0_3 = arith.constant 0 : index
    %c0_4 = arith.constant 0 : index
    %3 = vector.load %arg3[%c0_3, %c0_4] : memref<1x16xf32, #tpu.memory_space<vmem>>, vector<1x16xf32>
    %4 = vector.broadcast %3 : vector<1x16xf32> to vector<8x16xf32>
    %5 = arith.mulf %2, %4 : vector<8x16xf32>
    %c0_5 = arith.constant 0 : index
    %c0_6 = arith.constant 0 : index
    %6 = vector.load %arg4[%c0_5, %c0_6] : memref<1x16xf32, #tpu.memory_space<vmem>>, vector<1x16xf32>
    %7 = vector.broadcast %6 : vector<1x16xf32> to vector<8x16xf32>
    %8 = arith.addf %5, %7 : vector<8x16xf32>
    %cst_7 = arith.constant 0.000000e+00 : f32
    %9 = vector.broadcast %cst_7 : f32 to vector<8x16xf32>
    %10 = arith.maximumf %8, %9 : vector<8x16xf32>
    %c0_8 = arith.constant 0 : index
    %c0_9 = arith.constant 0 : index
    %11 = vector.load %arg5[%c0_8, %c0_9] : memref<8x16xf32, #tpu.memory_space<vmem>>, vector<8x16xf32>
    tpu.vector_store %arg5[%c0_8, %c0_9], %10 {strides = array<i32>} : memref<8x16xf32, #tpu.memory_space<vmem>>, vector<8x16xf32>,
    return
  }
  func.func @transform_0(%arg0: i32) -> (i32, i32) {
    %c0_i32 = arith.constant 0 : i32
    %c0_i32_0 = arith.constant 0 : i32
    return %arg0, %c0_i32 : i32, i32
  }
  func.func @transform_1(%arg0: i32) -> (i32, i32) {
    %c0_i32 = arith.constant 0 : i32
    %c0_i32_0 = arith.constant 0 : i32
    %c0_i32_1 = arith.constant 0 : i32
    return %c0_i32, %c0_i32_0 : i32, i32
  }
  func.func @transform_2(%arg0: i32) -> (i32, i32) {
    %c0_i32 = arith.constant 0 : i32
    %c0_i32_0 = arith.constant 0 : i32
    %c0_i32_1 = arith.constant 0 : i32
    return %c0_i32, %c0_i32_0 : i32, i32
  }
  func.func @transform_3(%arg0: i32) -> (i32, i32) {
    %c0_i32 = arith.constant 0 : i32
    %c0_i32_0 = arith.constant 0 : i32
    %c0_i32_1 = arith.constant 0 : i32
    return %c0_i32, %c0_i32_0 : i32, i32
  }
  func.func @transform_4(%arg0: i32) -> (i32, i32) {
    %c0_i32 = arith.constant 0 : i32
    %c0_i32_0 = arith.constant 0 : i32
    return %arg0, %c0_i32 : i32, i32
  }
}

</mosaic_0001>

<bundles_post_ra>
// kernel: tpu_custom_call.1
= control target key start
LH: loop header
LB: loop body
LE: loop exit
PB: predicated region body
PF: predicated region fallthrough
CT: control target
= control target key end

     0   :  { %9 = vsyncpa [#allocation3], 0  ;;  %s245_s0 = inlined_call_operand.hbm [shape: f32[8,32], index: 0, kind: input, shape index: {}]   ;;  %s246_s1 = inlined_call_operand.hbm [shape: f32[16,32], index: 1, kind: input, shape index: {}]   ;;  %s247_s2 = inlined_call_operand.vmem [shape: f32[1,16], index: 2, kind: input, shape index: {}]   ;;  %s248_s3 = inlined_call_operand.vmem [shape: f32[1,16], index: 3, kind: input, shape index: {}]   ;;  %s249_s4 = inlined_call_operand.hbm [shape: f32[8,16], index: 4, kind: output, shape index: {}]  }
   0x1   :  { %10 = vsyncpa [#allocation6], 0 }
   0x2   :  { %11 = vsyncpa [#allocation4], 0  ;;  %s17_s17 = sshll.u32 %s245_s0, 4  ;;  %s200_s18 = smov [#allocation2]   ;;  %s18_s17 = int_to_ptr.hbm [resolvable:$true] %s17_s17 }
   0x3   :  { %s19_s19 = sshll.u32 %s200_s18, 4  ;;  %s27_s22 = sshll.u32 %s246_s1, 4  ;;  %s20_s19 = int_to_ptr.vmem [resolvable:$true] %s19_s19  ;;  %s28_s22 = int_to_ptr.hbm [resolvable:$true] %s27_s22 }
   0x4   :  { %22 = dma.hbm_to_vmem [thread:$0]  %s18_s17, 128, %s20_s19, [#allocation3]  }
   0x5   :  { %s201_s23 = smov [#allocation5]   ;;  %s202_s25 = smov 128  }
   0x6   :  { %s29_s24 = sshll.u32 %s201_s23, 4  ;;  %s203_s26 = smov 8   ;;  %s30_s24 = int_to_ptr.vmem [resolvable:$true] %s29_s24 }
   0x7   :  { %35 = dma.hbm_to_vmem [thread:$0]  %s28_s22, 256, %s30_s24, [#allocation6], %s202_s25, %s202_s25, %s203_s26  }
   0x8   :  { %194 = dma.done.wait [#allocation3], 128  }
   0x9   :  { %195 = vsyncadd [#allocation3], 4294967168 }
   0xa   :  { %196 = dma.done.wait [#allocation6], 256  }
   0xb   :  { %197 = vsyncadd [#allocation6], 4294967040  ;;  %vm51_vm0 = vcmask 261120   ;;  %v50_v0 = vld [vmem:[#allocation5 + $0x8] sm:$0xff]  ;;  %v49_v1 = vld [vmem:[#allocation5] sm:$0xff]  ;;  %s204_s29 = smov [#allocation7]  }
   0xc   :  { %112 = vmatpush.xpose.msk.msra.mxu0 %vm51_vm0, %v50_v0  ;;  %v48_v2 = vld [vmem:[#allocation2] sm:$0xff]  ;;  %s99_s30 = sshll.u32 %s204_s29, 4  ;;  %s101_s7 = sshll.u32 %s249_s4, 4  ;;  %vm92_vm1 = vcmask 130048   ;;  %s100_s30 = int_to_ptr.vmem [resolvable:$true] %s99_s30  ;;  %s102_s7 = int_to_ptr.hbm [resolvable:$true] %s101_s7 }
   0xd   :  { %v120_v3 = vld [vmem:[%s247_s2] ss:$0 sm:$0xff] }
   0xe   :  { %v121_v4 = vld [vmem:[%s248_s3] ss:$0 sm:$0xff] }
  0x10   :  { %113 = vmatpush.xpose.msk.msra.mxu0 %vm51_vm0, %v49_v1 }
  0x13   :  { %114 = vmatmul.msk.f32.vlgmr.msra.gmra.mxu0 %vm51_vm0, %v48_v2 }
  0x90   :  { %v78_v5 = vpop.f32.mrf.mxu0 }
  0x91   :  { %v85_v6 = vmul.f32 %v120_v3, %v78_v5 }
  0x93   :  { %v90_v7 = vadd.f32 %v121_v4, %v85_v6 }
  0x95   :  { %v91_v8 = vmax.f32 %v90_v7, 0.0 }
  0x97   :  { %93 = vst.msk [vmem:[#allocation7] sm:$0xff] %vm92_vm1, %v91_v8 }
  0x98   :  { %104 = dma.vmem_to_hbm [thread:$0]  %s100_s30, 128, %s102_s7, [#allocation4]  }
  0x99   :  { %198 = dma.done.wait [#allocation4], 128  }
  0x9a   :  { %199 = vsyncadd [#allocation4], 4294967168 }
  0x9b   :  { %109 = vsyncpa [#allocation3], 1 }
  0x9c   :  { %110 = vsyncpa [#allocation6], 1 }
  0x9d   :  { %111 = vsyncpa [#allocation4], 1 }

</bundles_post_ra>
